<compile_context>
chip_gen: v6e
topology: v6e:2x2x1
jax: 0.10.0
libtpu: 0.0.40
codegen_flags: <defaults>
</compile_context>

<pallas_src>
import functools

import jax
import jax.numpy as jnp
from jax.experimental import pallas as pl
from jax.experimental.pallas import tpu as pltpu


# ---------------------------------------------------------------------------
# Config (small, consistent with the module's __init__)
# ---------------------------------------------------------------------------
CONFIG = {
    "num_users": 64,
    "num_items": 64,
    "latent_dim_mf": 8,
    "latent_dim_mlp": 8,
    "layers": [16, 32, 16, 8],   # layers[0] == 2 * latent_dim_mlp
}
BATCH = 8


# ---------------------------------------------------------------------------
# Pallas kernel: fused gather + layer-0 + MF + MLP + affine head + sigmoid
# ---------------------------------------------------------------------------
def neumf_kernel(num_fc_layers, pad, dmf, num_users,
                 idx_ref, gather_ref, w_ref, misc_ref, out_ref):
    batch = idx_ref.shape[1]
    n_rows = gather_ref.shape[1]          # num_users + num_items

    # ---- concatenated one-hot, transposed: (U+I, B), two 1s per column ----
    # NOTE: out-of-range indices silently select a zero column (differs from
    # a framework gather, which would fault) -- acceptable for this module.
    u_row = idx_ref[0:1, :]                                   # (1, B) int32
    i_row = idx_ref[1:2, :] + num_users                       # (1, B) int32
    row_iota = jax.lax.broadcasted_iota(jnp.int32, (n_rows, batch), 0)
    onehot_t = ((row_iota == u_row) | (row_iota == i_row))
    onehot_t = onehot_t.astype(jnp.float32).astype(gather_ref.dtype)

    # ---- single K=128 MXU op: MLP gather + layer-0 + both MF gathers -------
    # gather_ref: (pad + 2*dmf, U+I) bf16; result accumulated in f32.
    res_t = jnp.dot(gather_ref[...], onehot_t,
                    preferred_element_type=jnp.float32)       # (pad+2dmf, B)

    x_t = res_t[:pad, :]                                       # layer-0 pre-bias
    u_mf_t = res_t[pad:pad + dmf, :]                            # (dmf, B)
    i_mf_t = res_t[pad + dmf:pad + 2 * dmf, :]                  # (dmf, B)
    mf_t = u_mf_t * i_mf_t                                      # GMF tower (VPU)

    # ---- MLP tower, feature-major; activations stay f32 --------------------
    misc = misc_ref[...].astype(jnp.float32)                    # (pad, L+3)
    x_t = jnp.maximum(x_t + misc[:, 0:1], 0.0)                  # layer 0 bias+ReLU
    for l in range(1, num_fc_layers):
        w_t = w_ref[l - 1].astype(jnp.float32)                  # (pad, pad) = W_l^T
        x_t = jnp.dot(w_t, x_t, preferred_element_type=jnp.float32) + misc[:, l:l + 1]
        x_t = jnp.maximum(x_t, 0.0)

    # ---- affine head: VPU multiply + sublane reduce, lane-dense (1, B) out --
    wa_x = misc[:, num_fc_layers:num_fc_layers + 1]             # (pad, 1)
    wa_mf = misc[:dmf, num_fc_layers + 1:num_fc_layers + 2]     # (dmf, 1)
    ba = misc[0:1, num_fc_layers + 2:num_fc_layers + 3]         # (1, 1)
    logits = (jnp.sum(x_t * wa_x, axis=0, keepdims=True)
              + jnp.sum(mf_t * wa_mf, axis=0, keepdims=True)
              + ba)                                             # (1, B)
    out_ref[...] = jax.nn.sigmoid(logits).astype(out_ref.dtype)


# ---------------------------------------------------------------------------
# Wrapper: grid-less pallas_call, 4 consolidated VMEM inputs
# ---------------------------------------------------------------------------
def neumf_forward(packed, user_indices, item_indices):
    meta = packed["meta"]
    pad, dmf = meta["pad"], meta["dmf"]
    num_fc_layers = meta["num_fc_layers"]
    n_rows = meta["num_users"] + meta["num_items"]

    idx = jnp.stack([user_indices.astype(jnp.int32),
                     item_indices.astype(jnp.int32)], axis=0)   # (2, B)
    batch = idx.shape[1]

    inputs = [idx, packed["gather_t"], packed["w_rest_t"], packed["misc"]]

    gather_flops = 2 * batch * n_rows * (pad + 2 * dmf)
    fc_flops = 2 * batch * (num_fc_layers - 1) * pad * pad
    head_flops = 2 * batch * (pad + dmf)
    bytes_accessed = sum(int(a.size) * a.dtype.itemsize for a in inputs) + batch * 4

    vmem = pl.BlockSpec(memory_space=pltpu.MemorySpace.VMEM)

    out = pl.pallas_call(
        functools.partial(neumf_kernel, num_fc_layers, pad, dmf,
                          meta["num_users"]),
        out_shape=jax.ShapeDtypeStruct((1, batch), jnp.float32),
        in_specs=[vmem] * len(inputs),
        out_specs=vmem,
        cost_estimate=pl.CostEstimate(
            flops=int(gather_flops + fc_flops + head_flops),
            transcendentals=int(batch),
            bytes_accessed=int(bytes_accessed)),
    )(*inputs)
    return out.reshape(batch, 1)


# ---------------------------------------------------------------------------
# Parameter init (normal(0, 0.01) like the PyTorch module)
# ---------------------------------------------------------------------------
def init_params(key, config):
    ks = jax.random.split(key, 16)
    it = iter(ks)

    def normal(k, shape):
        return (0.01 * jax.random.normal(k, shape)).astype(jnp.float32)

    params = {
        "emb_user_mlp": normal(next(it), (config["num_users"], config["latent_dim_mlp"])),
        "emb_item_mlp": normal(next(it), (config["num_items"], config["latent_dim_mlp"])),
        "emb_user_mf": normal(next(it), (config["num_users"], config["latent_dim_mf"])),
        "emb_item_mf": normal(next(it), (config["num_items"], config["latent_dim_mf"])),
    }

    fc = []
    for in_size, out_size in zip(config["layers"][:-1], config["layers"][1:]):
        w = normal(next(it), (in_size, out_size))               # stored (in, out)
        bound = 1.0 / jnp.sqrt(in_size)
        b = jax.random.uniform(next(it), (1, out_size), jnp.float32, -bound, bound)
        fc.append((w, b))
    params["fc"] = fc

    affine_in = config["layers"][-1] + config["latent_dim_mf"]
    params["affine_w"] = normal(next(it), (affine_in, 1))
    bound = 1.0 / jnp.sqrt(affine_in)
    params["affine_b"] = jax.random.uniform(next(it), (1, 1), jnp.float32, -bound, bound)
    return params


# ---------------------------------------------------------------------------
# One-time packing: fold layer-0 into the gather table, transpose to
# feature-major, consolidate biases + head, cast to bf16.
# ---------------------------------------------------------------------------
def pack_params(params, config):
    layers = config["layers"]
    dmlp = config["latent_dim_mlp"]
    dmf = config["latent_dim_mf"]
    num_fc_layers = len(layers) - 1
    pad = max(max(layers), dmf)
    num_users, num_items = config["num_users"], config["num_items"]

    assert layers[0] == 2 * dmlp, "layers[0] must equal 2 * latent_dim_mlp"
    assert pad >= layers[0] and pad >= dmf

    # Fold layer-0 into the MLP gather (f32 compute, then cast once).
    w0, _ = params["fc"][0]                                     # (2*dmlp, out1)
    out1 = w0.shape[1]
    t_user = params["emb_user_mlp"] @ w0[:dmlp, :]              # (U, out1)
    t_item = params["emb_item_mlp"] @ w0[dmlp:, :]              # (I, out1)

    gather = jnp.zeros((num_users + num_items, pad + 2 * dmf), jnp.float32)
    gather = gather.at[:num_users, :out1].set(t_user)
    gather = gather.at[num_users:, :out1].set(t_item)
    gather = gather.at[:num_users, pad:pad + dmf].set(params["emb_user_mf"])
    gather = gather.at[num_users:, pad + dmf:pad + 2 * dmf].set(params["emb_item_mf"])
    gather_t = gather.T                                         # (pad+2dmf, U+I)

    # Remaining FC layers, transposed (feature-major) + zero-padded.
    w_rest_t = jnp.zeros((max(num_fc_layers - 1, 1), pad, pad), jnp.float32)
    for l in range(1, num_fc_layers):
        w, _ = params["fc"][l]                                  # (in_l, out_l)
        in_l, out_l = w.shape
        w_rest_t = w_rest_t.at[l - 1, :out_l, :in_l].set(w.T)

    # misc: columns 0..L-1 = layer biases; L = head weight for x;
    #       L+1 = head weight for mf; L+2 row 0 = head bias.
    misc = jnp.zeros((pad, num_fc_layers + 3), jnp.float32)
    for l in range(num_fc_layers):
        _, b = params["fc"][l]
        misc = misc.at[:b.shape[1], l].set(b[0])
    h_dim = layers[-1]
    misc = misc.at[:h_dim, num_fc_layers].set(params["affine_w"][:h_dim, 0])
    misc = misc.at[:dmf, num_fc_layers + 1].set(params["affine_w"][h_dim:, 0])
    misc = misc.at[0, num_fc_layers + 2].set(params["affine_b"][0, 0])

    dt = jnp.bfloat16
    return {
        "gather_t": gather_t.astype(dt),
        "w_rest_t": w_rest_t.astype(dt),
        "misc": misc.astype(dt),
        "meta": dict(pad=pad, dmf=dmf, num_users=num_users, num_items=num_items,
                     num_fc_layers=num_fc_layers),
    }


# ---------------------------------------------------------------------------
# References
# ---------------------------------------------------------------------------
def neumf_reference(params, user_indices, item_indices):
    """Original module semantics, pure f32."""
    u_mlp = params["emb_user_mlp"][user_indices]
    i_mlp = params["emb_item_mlp"][item_indices]
    u_mf = params["emb_user_mf"][user_indices]
    i_mf = params["emb_item_mf"][item_indices]
    x = jnp.concatenate([u_mlp, i_mlp], axis=-1)
    mf = u_mf * i_mf
    for w, b in params["fc"]:
        x = jnp.maximum(x @ w + b, 0.0)
    vec = jnp.concatenate([x, mf], axis=-1)
    logits = vec @ params["affine_w"] + params["affine_b"]
    return jax.nn.sigmoid(logits)


def neumf_packed_reference(packed, user_indices, item_indices):
    """Same algebra as the kernel, pure JAX, using the packed bf16 params."""
    meta = packed["meta"]
    pad, dmf, L = meta["pad"], meta["dmf"], meta["num_fc_layers"]
    num_users = meta["num_users"]
    g = packed["gather_t"].astype(jnp.float32)
    w = packed["w_rest_t"].astype(jnp.float32)
    m = packed["misc"].astype(jnp.float32)
    res = g[:, user_indices] + g[:, num_users + item_indices]   # (pad+2dmf, B)
    x = jnp.maximum(res[:pad] + m[:, 0:1], 0.0)
    mf = res[pad:pad + dmf] * res[pad + dmf:pad + 2 * dmf]
    for l in range(1, L):
        x = jnp.maximum(w[l - 1] @ x + m[:, l:l + 1], 0.0)
    logits = (jnp.sum(x * m[:, L:L + 1], axis=0, keepdims=True)
              + jnp.sum(mf * m[:dmf, L + 1:L + 2], axis=0, keepdims=True)
              + m[0:1, L + 2:L + 3])
    return jax.nn.sigmoid(logits).reshape(-1, 1)


if __name__ == "__main__":
    key = jax.random.PRNGKey(0)
    pkey, ukey, ikey = jax.random.split(key, 3)

    params = init_params(pkey, CONFIG)
    packed = pack_params(params, CONFIG)

    user_indices = jax.random.randint(ukey, (BATCH,), 0, CONFIG["num_users"], jnp.int32)
    item_indices = jax.random.randint(ikey, (BATCH,), 0, CONFIG["num_items"], jnp.int32)

    rating = neumf_forward(packed, user_indices, item_indices)
    rating = jax.block_until_ready(rating)
    assert rating.shape == (BATCH, 1)

    # Strict check: kernel vs identical algebra on the same bf16-packed params.
    ref_packed = neumf_packed_reference(packed, user_indices, item_indices)
    assert jnp.allclose(rating, ref_packed, atol=1e-5, rtol=1e-5), \
        "mismatch vs packed reference"

    # Semantic check: kernel vs full-f32 module reference (bf16 param rounding
    # bounds the difference well below 2e-3 at this init scale).
    ref_full = neumf_reference(params, user_indices, item_indices)
    assert jnp.allclose(rating, ref_full, atol=2e-3, rtol=2e-3), \
        "mismatch vs f32 module reference"

    print("KERNEL_OK")
</pallas_src>

<mosaic_0001>
module attributes {stable_mosaic.version = 11 : i64} {
  func.func @neumf_kernel(%arg0: memref<2x8xi32, #tpu.memory_space<vmem>>, %arg1: memref<48x128xbf16, #tpu.memory_space<vmem>>, %arg2: memref<2x32x32xbf16, #tpu.memory_space<vmem>>, %arg3: memref<32x6xbf16, #tpu.memory_space<vmem>>, %arg4: memref<1x8xf32, #tpu.memory_space<vmem>>) attributes {dimension_semantics = [], scalar_prefetch = 0 : i64, scratch_operands = 0 : i64, tpu.core_type = #tpu.core_type<tc>} {
    %c0 = arith.constant 0 : index
    %c0_0 = arith.constant 0 : index
    %0 = vector.load %arg0[%c0, %c0_0] : memref<2x8xi32, #tpu.memory_space<vmem>>, vector<1x8xi32>
    %c1 = arith.constant 1 : index
    %c0_1 = arith.constant 0 : index
    %1 = vector.load %arg0[%c1, %c0_1] : memref<2x8xi32, #tpu.memory_space<vmem>>, vector<1x8xi32>
    %c64_i32 = arith.constant 64 : i32
    %2 = vector.broadcast %c64_i32 : i32 to vector<1x8xi32>
    %3 = arith.addi %1, %2 : vector<1x8xi32>
    %4 = tpu.iota {dimensions = array<i32: 0>} : vector<128x8xi32>
    %5 = vector.broadcast %0 : vector<1x8xi32> to vector<128x8xi32>
    %6 = arith.cmpi eq, %4, %5 : vector<128x8xi32>
    %7 = vector.broadcast %3 : vector<1x8xi32> to vector<128x8xi32>
    %8 = arith.cmpi eq, %4, %7 : vector<128x8xi32>
    %9 = arith.ori %6, %8 : vector<128x8xi1>
    %10 = arith.extui %9 : vector<128x8xi1> to vector<128x8xi32>
    %11 = arith.sitofp %10 : vector<128x8xi32> to vector<128x8xf32>
    %12 = arith.truncf %11 : vector<128x8xf32> to vector<128x8xbf16>
    %c0_2 = arith.constant 0 : index
    %c0_3 = arith.constant 0 : index
    %13 = vector.load %arg1[%c0_2, %c0_3] : memref<48x128xbf16, #tpu.memory_space<vmem>>, vector<48x128xbf16>
    %cst = arith.constant dense<0.000000e+00> : vector<48x8xf32>
    %14 = tpu.matmul %13, %12, %cst {dimension_numbers = #tpu.dot_dimension_numbers<[1], [0], [0], [1], [0, 0, 1, 1], [], []>} : vector<48x128xbf16>, vector<128x8xbf16>, vector<48x8xf32> -> vector<48x8xf32>
    %15 = vector.extract_strided_slice %14 {offsets = [0, 0], sizes = [32, 8], strides = [1, 1]} : vector<48x8xf32> to vector<32x8xf32>
    %16 = vector.extract_strided_slice %14 {offsets = [32, 0], sizes = [8, 8], strides = [1, 1]} : vector<48x8xf32> to vector<8x8xf32>
    %17 = vector.extract_strided_slice %14 {offsets = [40, 0], sizes = [8, 8], strides = [1, 1]} : vector<48x8xf32> to vector<8x8xf32>
    %18 = arith.mulf %16, %17 : vector<8x8xf32>
    %c0_4 = arith.constant 0 : index
    %c0_5 = arith.constant 0 : index
    %19 = vector.load %arg3[%c0_4, %c0_5] : memref<32x6xbf16, #tpu.memory_space<vmem>>, vector<32x6xbf16>
    %20 = arith.extf %19 : vector<32x6xbf16> to vector<32x6xf32>
    %21 = vector.extract_strided_slice %20 {offsets = [0, 0], sizes = [32, 1], strides = [1, 1]} : vector<32x6xf32> to vector<32x1xf32>
    %22 = vector.broadcast %21 : vector<32x1xf32> to vector<32x8xf32>
    %23 = arith.addf %15, %22 : vector<32x8xf32>
    %cst_6 = arith.constant 0.000000e+00 : f32
    %24 = vector.broadcast %cst_6 : f32 to vector<32x8xf32>
    %25 = arith.maximumf %23, %24 : vector<32x8xf32>
    %c0_7 = arith.constant 0 : index
    %c0_8 = arith.constant 0 : index
    %c0_9 = arith.constant 0 : index
    %26 = vector.load %arg2[%c0_7, %c0_8, %c0_9] : memref<2x32x32xbf16, #tpu.memory_space<vmem>>, vector<1x32x32xbf16>
    %27 = vector.shape_cast %26 : vector<1x32x32xbf16> to vector<32x32xbf16>
    %28 = arith.extf %27 : vector<32x32xbf16> to vector<32x32xf32>
    %cst_10 = arith.constant dense<0.000000e+00> : vector<32x8xf32>
    %29 = tpu.matmul %28, %25, %cst_10 {dimension_numbers = #tpu.dot_dimension_numbers<[1], [0], [0], [1], [0, 0, 1, 1], [], []>} : vector<32x32xf32>, vector<32x8xf32>, vector<32x8xf32> -> vector<32x8xf32>
    %30 = vector.extract_strided_slice %20 {offsets = [0, 1], sizes = [32, 1], strides = [1, 1]} : vector<32x6xf32> to vector<32x1xf32>
    %31 = vector.broadcast %30 : vector<32x1xf32> to vector<32x8xf32>
    %32 = arith.addf %29, %31 : vector<32x8xf32>
    %cst_11 = arith.constant 0.000000e+00 : f32
    %33 = vector.broadcast %cst_11 : f32 to vector<32x8xf32>
    %34 = arith.maximumf %32, %33 : vector<32x8xf32>
    %c1_12 = arith.constant 1 : index
    %c0_13 = arith.constant 0 : index
    %c0_14 = arith.constant 0 : index
    %35 = vector.load %arg2[%c1_12, %c0_13, %c0_14] : memref<2x32x32xbf16, #tpu.memory_space<vmem>>, vector<1x32x32xbf16>
    %36 = vector.shape_cast %35 : vector<1x32x32xbf16> to vector<32x32xbf16>
    %37 = arith.extf %36 : vector<32x32xbf16> to vector<32x32xf32>
    %cst_15 = arith.constant dense<0.000000e+00> : vector<32x8xf32>
    %38 = tpu.matmul %37, %34, %cst_15 {dimension_numbers = #tpu.dot_dimension_numbers<[1], [0], [0], [1], [0, 0, 1, 1], [], []>} : vector<32x32xf32>, vector<32x8xf32>, vector<32x8xf32> -> vector<32x8xf32>
    %39 = vector.extract_strided_slice %20 {offsets = [0, 2], sizes = [32, 1], strides = [1, 1]} : vector<32x6xf32> to vector<32x1xf32>
    %40 = vector.broadcast %39 : vector<32x1xf32> to vector<32x8xf32>
    %41 = arith.addf %38, %40 : vector<32x8xf32>
    %cst_16 = arith.constant 0.000000e+00 : f32
    %42 = vector.broadcast %cst_16 : f32 to vector<32x8xf32>
    %43 = arith.maximumf %41, %42 : vector<32x8xf32>
    %44 = vector.extract_strided_slice %20 {offsets = [0, 3], sizes = [32, 1], strides = [1, 1]} : vector<32x6xf32> to vector<32x1xf32>
    %45 = vector.extract_strided_slice %20 {offsets = [0, 4], sizes = [8, 1], strides = [1, 1]} : vector<32x6xf32> to vector<8x1xf32>
    %46 = vector.extract_strided_slice %20 {offsets = [0, 5], sizes = [1, 1], strides = [1, 1]} : vector<32x6xf32> to vector<1x1xf32>
    %47 = vector.broadcast %44 : vector<32x1xf32> to vector<32x8xf32>
    %48 = arith.mulf %43, %47 : vector<32x8xf32>
    %cst_17 = arith.constant dense<0.000000e+00> : vector<8xf32>
    %49 = vector.multi_reduction <add>, %48, %cst_17 [0] : vector<32x8xf32> to vector<8xf32>
    %50 = vector.shape_cast %49 : vector<8xf32> to vector<1x8xf32>
    %51 = vector.broadcast %45 : vector<8x1xf32> to vector<8x8xf32>
    %52 = arith.mulf %18, %51 : vector<8x8xf32>
    %cst_18 = arith.constant dense<0.000000e+00> : vector<8xf32>
    %53 = vector.multi_reduction <add>, %52, %cst_18 [0] : vector<8x8xf32> to vector<8xf32>
    %54 = vector.shape_cast %53 : vector<8xf32> to vector<1x8xf32>
    %55 = arith.addf %50, %54 : vector<1x8xf32>
    %56 = vector.broadcast %46 : vector<1x1xf32> to vector<1x8xf32>
    %57 = arith.addf %55, %56 : vector<1x8xf32>
    %58 = arith.negf %57 : vector<1x8xf32>
    %59 = math.exp %58 : vector<1x8xf32>
    %cst_19 = arith.constant 1.000000e+00 : f32
    %60 = vector.broadcast %cst_19 : f32 to vector<1x8xf32>
    %61 = arith.addf %60, %59 : vector<1x8xf32>
    %62 = arith.divf %60, %61 : vector<1x8xf32>
    %c0_20 = arith.constant 0 : index
    %c0_21 = arith.constant 0 : index
    %63 = vector.load %arg4[%c0_20, %c0_21] : memref<1x8xf32, #tpu.memory_space<vmem>>, vector<1x8xf32>
    tpu.vector_store %arg4[%c0_20, %c0_21], %62 {strides = array<i32>} : memref<1x8xf32, #tpu.memory_space<vmem>>, vector<1x8xf32>,
    return
  }
}

</mosaic_0001>

<bundles_post_ra>
// kernel: tpu_custom_call.1
= control target key start
LH: loop header
LB: loop body
LE: loop exit
PB: predicated region body
PF: predicated region fallthrough
CT: control target
= control target key end

     0   :  { %9 = vsyncpa [#allocation3], 0  ;;  %s1112_s0 = inlined_call_operand.vmem [shape: s32[2,8], index: 0, kind: input, shape index: {}]   ;;  %s1113_s1 = inlined_call_operand.hbm [shape: bf16[48,128], index: 1, kind: input, shape index: {}]   ;;  %s1114_s2 = inlined_call_operand.hbm [shape: bf16[2,32,32], index: 2, kind: input, shape index: {}]   ;;  %s1115_s3 = inlined_call_operand.vmem [shape: bf16[32,6], index: 3, kind: input, shape index: {}]   ;;  %s1116_s4 = inlined_call_operand.hbm [shape: f32[1,8], index: 4, kind: output, shape index: {}]  }
   0x1   :  { %10 = vsyncpa [#allocation6], 0 }
   0x2   :  { %11 = vsyncpa [#allocation4], 0  ;;  %s885_s15 = smov [#allocation2]  }
   0x3   :  { %s19_s16 = sshll.u32 %s885_s15, 4  ;;  %s20_s16 = int_to_ptr.vmem [resolvable:$true] %s19_s16 }
   0x4   :  { %s827_s17 = scalar_lea.vmem %s20_s16, 384  ;;  %p832_p1 = scmp.lt.s32.totalorder %s20_s16, %s20_s16 }
   0x5   :  { %p828_p0 = scmp.ne.s32.totalorder %s20_s16, %s827_s17  ;;  %p833_p2 = scmp.lt.s32.totalorder %s827_s17, %s827_s17 }
   0x7   :  { %p834_p3 = por %p833_p2, %p832_p1 }
   0x9   :  { %p835_p4 = pnand %p834_p3, %p828_p0 }
   0xb   :  { %838 = shalt.err (!%p835_p4)
}
   0xc   :  { %s886_s18 = smov 64   ;;  %s887_s19 = smov 4  }
   0xd   :  { %25 = dma.hbm_to_vmem [thread:$0]  %s1113_s1, 384, %s20_s16, [#allocation3], %s886_s18, %s886_s18, %s887_s19  }
   0xe   :  { %s888_s22 = smov [#allocation5]  }
   0xf   :  { %s31_s23 = sshll.u32 %s888_s22, 4  ;;  %s32_s23 = int_to_ptr.vmem [resolvable:$true] %s31_s23 }
  0x10   :  { %s847_s24 = scalar_lea.vmem %s32_s23, 512  ;;  %p852_p6 = scmp.lt.s32.totalorder %s32_s23, %s32_s23 }
  0x11   :  { %p848_p5 = scmp.ne.s32.totalorder %s32_s23, %s847_s24  ;;  %p853_p7 = scmp.lt.s32.totalorder %s847_s24, %s847_s24 }
  0x13   :  { %p854_p8 = por %p853_p7, %p852_p6 }
  0x15   :  { %p855_p9 = pnand %p854_p8, %p848_p5 }
  0x17   :  { %858 = shalt.err (!%p855_p9)
}
  0x18   :  { %37 = dma.hbm_to_vmem [thread:$0]  %s1114_s2, 512, %s32_s23, [#allocation6], %s886_s18, %s886_s18, %s887_s19  }
  0x19   :  { %879 = dma.done.wait [#allocation3], 384  }
  0x1a   :  { %880 = vsyncadd [#allocation3], 4294966912 }
  0x1b   :  { %881 = dma.done.wait [#allocation6], 512  }
  0x1c   :  { %882 = vsyncadd [#allocation6], 4294966784  ;;  %v50_v0 = vlaneseq  ;;  %v889_v1 = vmov 0.0   ;;  %vm890_vm0 = vmmov 0   ;;  %v891_v3 = vmov 0   ;;  %v655_v15 = vld [vmem:[%s1115_s3] sm:$0xff]  }
  0x1d   :  { %708 = vmatprep.subr.bf16.mxu0 %v889_v1  ;;  %724 = vmatprep.mubr.msk.bf16.mxu0 %vm890_vm0, %v889_v1  ;;  %v940_v6 = vld [vmem:[%s1112_s0] ss:$0 sm:$0xff]  ;;  %v48_v7 = vld [vmem:[%s1112_s0 + $0x1] sm:$0x1]  ;;  %v678_v16 = vld [vmem:[%s1115_s3 + $0x8] sm:$0xff]   ;;  %v975_v21 = vunpack.c.h.bf16 %v655_v15  ;;  %v986_v24 = vunpack.c.l.bf16 %v655_v15  ;;  %v893_v44 = vmov 1  }
  0x1e   :  { %v933_v2 = vshrl.u32 %v50_v0, 7  ;;  %779 = vset.pattern.permute.xlu1 %v891_v3  ;;  %778 = vset.pattern.permute.xlu0 %v891_v3  ;;  %v49_v9 = vadd.s32 64, %v48_v7  ;;  %v892_v18 = vmov 1.0|1.0   ;;  %v980_v22 = vunpack.c.h.bf16 %v678_v16  ;;  %v808_v40 = vld [vmem:[#allocation2] sm:$0xff]   ;;  %v809_v41 = vld [vmem:[#allocation2 + $0x8] sm:$0xff]  }
  0x1f   :  { %260 = vperm.xlu1 %779, %v975_v21   ;;  %v996_v27 = vunpack.c.l.bf16 %v678_v16  ;;  %v663_v42 = vld [vmem:[#allocation5] sm:$0xff]   ;;  %v679_v0 = vld [vmem:[#allocation5 + $0x8] sm:$0xff]   ;;  %v680_v30 = vld [vmem:[#allocation5 + $0x18] sm:$0xff]   ;;  %s898_s3 = smov [#allocation7]  }
  0x20   :  { %v65_v4 = vadd.s32 112, %v933_v2  ;;  %v89_v5 = vsub.s32 0, %v933_v2  ;;  %v66_v8 = vadd.s32 120, %v933_v2  ;;  %v63_v10 = vadd.s32 96, %v933_v2  ;;  %270 = vperm.xlu0 %778, %v980_v22   ;;  %s599_s6 = sshll.u32 %s898_s3, 4  ;;  %s600_s6 = int_to_ptr.vmem [resolvable:$true] %s599_s6 }
  0x21   :  { %v64_v12 = vadd.s32 104, %v933_v2  ;;  %v61_v13 = vadd.s32 80, %v933_v2  ;;  %v62_v14 = vadd.s32 88, %v933_v2  ;;  %v59_v17 = vadd.s32 64, %v933_v2  ;;  %s859_s7 = scalar_lea.vmem %s600_s6, 16  ;;  %s863_s8 = scalar_lea.vmem %s600_s6, 32 }
  0x22   :  { %vm85_vm1 = vcmp.eq.s32.totalorder %v65_v4, %v940_v6  ;;  %v948_v11 = vrot.slane %v49_v9, %v89_v5  ;;  %vm86_vm2 = vcmp.eq.s32.totalorder %v66_v8, %v940_v6  ;;  %vm83_vm6 = vcmp.eq.s32.totalorder %v63_v10, %v940_v6  ;;  %v810_v5 = vld [vmem:[#allocation2 + $0x10] sm:$0xff]   ;;  %p860_p10 = scmp.ne.s32.totalorder %s600_s6, %s859_s7  ;;  %p864_p11 = scmp.lt.s32.totalorder %s600_s6, %s600_s6 }
  0x23   :  { %vm84_vm9 = vcmp.eq.s32.totalorder %v64_v12, %v940_v6  ;;  %vm81_vm13 = vcmp.eq.s32.totalorder %v61_v13, %v940_v6  ;;  %v60_v20 = vadd.s32 72, %v933_v2  ;;  %v57_v23 = vadd.s32 48, %v933_v2  ;;  %255 = vperm.xlu1 %779, %v986_v24   ;;  %p865_p12 = scmp.lt.s32.totalorder %s863_s8, %s859_s7 }
  0x24   :  { %vm105_vm3 = vcmp.eq.s32.totalorder %v65_v4, %v948_v11  ;;  %vm106_vm4 = vcmp.eq.s32.totalorder %v66_v8, %v948_v11  ;;  %vm103_vm7 = vcmp.eq.s32.totalorder %v63_v10, %v948_v11  ;;  %vm104_vm10 = vcmp.eq.s32.totalorder %v64_v12, %v948_v11  ;;  %265 = vperm.xlu0 %778, %v996_v27  }
  0x25   :  { %vm121_vm5 = vmor %vm85_vm1, %vm105_vm3  ;;  %vm101_vm14 = vcmp.eq.s32.totalorder %v61_v13, %v948_v11  ;;  %vm82_vm1 = vcmp.eq.s32.totalorder %v62_v14, %v940_v6  ;;  %v58_v26 = vadd.s32 56, %v933_v2  ;;  %v55_v29 = vadd.s32 32, %v933_v2  ;;  %p866_p13 = por %p865_p12, %p864_p11 }
  0x26   :  { %vm122_vm8 = vmor %vm86_vm2, %vm106_vm4  ;;  %vm102_vm2 = vcmp.eq.s32.totalorder %v62_v14, %v948_v11  ;;  %v56_v31 = vadd.s32 40, %v933_v2  ;;  %v53_v34 = vadd.s32 16, %v933_v2  ;;  %v54_v36 = vadd.s32 24, %v933_v2 }
  0x27   :  { %vm629_vm11 = vmpackc.low %vm122_vm8, %vm121_vm5  ;;  %vm79_vm5 = vcmp.eq.s32.totalorder %v59_v17, %v940_v6  ;;  %vm80_vm8 = vcmp.eq.s32.totalorder %v60_v20, %v940_v6  ;;  %v52_v39 = vadd.s32 8, %v933_v2  ;;  %v664_v43 = vunpack.c.l.bf16 %v663_v42  ;;  %781 = vset.pattern.permute.xlu1 %v893_v44  ;;  %p867_p0 = pnand %p866_p13, %p860_p10 }
  0x28   :  { %709 = vmatpush3.bf16.msk.msra.mxu0 %vm629_vm11, %v892_v18  ;;  %vm968_vm12 = vmor %vm83_vm6, %vm103_vm7  ;;  %vm99_vm6 = vcmp.eq.s32.totalorder %v59_v17, %v948_v11  ;;  %780 = vset.pattern.permute.xlu0 %v893_v44  ;;  %v668_v3 = vunpack.c.l.bf16 %v679_v0  ;;  %v669_v4 = vunpack.c.h.bf16 %v679_v0  ;;  %v783_v8 = vpack.i.bf16 %v975_v21, %v986_v24 }
  0x29   :  { %710 = vmatprep.subr.bf16.mxu0 %v889_v1  ;;  %vm120_vm15 = vmor %vm84_vm9, %vm104_vm10  ;;  %vm100_vm9 = vcmp.eq.s32.totalorder %v60_v20, %v948_v11  ;;  %298 = vperm.xlu1 %781, %v996_v27   ;;  %v789_v9 = vpack.i.bf16 %v980_v22, %v996_v27  ;;  %v894_v10 = vmov 2   ;;  %v896_v12 = vmov 4  }
  0x2a   :  { %vm631_vm3 = vmpackc.low %vm120_vm15, %vm968_vm12  ;;  %vm77_vm12 = vcmp.eq.s32.totalorder %v57_v23, %v940_v6  ;;  %vm78_vm15 = vcmp.eq.s32.totalorder %v58_v26, %v940_v6  ;;  %302 = vperm.xlu0 %780, %v980_v22   ;;  %v897_v13 = vmov 5   ;;  %v676_v32 = vunpack.c.l.bf16 %v680_v30 }
  0x2b   :  { %vm988_vm4 = vmor %vm81_vm13, %vm101_vm14  ;;  %vm97_vm13 = vcmp.eq.s32.totalorder %v57_v23, %v948_v11  ;;  %v677_v33 = vunpack.c.h.bf16 %v680_v30 }
  0x2c   :  { %711 = vmatpush3.bf16.msk.msra.mxu0 %vm631_vm3, %v892_v18  ;;  %vm999_vm7 = vmor %vm82_vm1, %vm102_vm2  ;;  %vm98_vm1 = vcmp.eq.s32.totalorder %v58_v26, %v948_v11 }
  0x2d   :  { %712 = vmatprep.subr.bf16.mxu0 %v889_v1  ;;  %vm633_vm10 = vmpackc.low %vm999_vm7, %vm988_vm4  ;;  %vm75_vm4 = vcmp.eq.s32.totalorder %v55_v29, %v940_v6  ;;  %vm76_vm7 = vcmp.eq.s32.totalorder %v56_v31, %v940_v6  ;;  %294 = vperm.xlu1 %781, %v975_v21  }
  0x2e   :  { %vm1011_vm11 = vmor %vm79_vm5, %vm99_vm6  ;;  %vm95_vm5 = vcmp.eq.s32.totalorder %v55_v29, %v948_v11  ;;  %290 = vperm.xlu0 %780, %v986_v24  }
  0x2f   :  { %vm1019_vm14 = vmor %vm80_vm8, %vm100_vm9  ;;  %vm96_vm8 = vcmp.eq.s32.totalorder %v56_v31, %v948_v11 }
  0x30   :  { %713 = vmatpush3.bf16.msk.msra.mxu0 %vm633_vm10, %v892_v18  ;;  %vm635_vm2 = vmpackc.low %vm1019_vm14, %vm1011_vm11  ;;  %vm74_vm14 = vcmp.eq.s32.totalorder %v54_v36, %v940_v6 }
  0x31   :  { %714 = vmatprep.subr.bf16.mxu0 %v889_v1  ;;  %vm1032_vm3 = vmor %vm77_vm12, %vm97_vm13  ;;  %vm73_vm12 = vcmp.eq.s32.totalorder %v53_v34, %v940_v6  ;;  %vm93_vm13 = vcmp.eq.s32.totalorder %v53_v34, %v948_v11  ;;  %782 = vset.pattern.permute.xlu1 %v894_v10 }
  0x32   :  { %vm1039_vm6 = vmor %vm78_vm15, %vm98_vm1  ;;  %vm94_vm15 = vcmp.eq.s32.totalorder %v54_v36, %v948_v11  ;;  %788 = vset.pattern.permute.xlu0 %v894_v10  ;;  %784 = vperm.xlu1 %782, %v783_v8  }
  0x33   :  { %vm637_vm9 = vmpackc.low %vm1039_vm6, %vm1032_vm3  ;;  %vm72_vm6 = vcmp.eq.s32.totalorder %v52_v39, %v940_v6  ;;  %790 = vperm.xlu0 %788, %v789_v9  }
  0x34   :  { %715 = vmatpush3.bf16.msk.msra.mxu0 %vm635_vm2, %v892_v18  ;;  %vm1051_vm10 = vmor %vm75_vm4, %vm95_vm5  ;;  %vm71_vm4 = vcmp.eq.s32.totalorder %v933_v2, %v940_v6  ;;  %vm91_vm5 = vcmp.eq.s32.totalorder %v933_v2, %v948_v11  ;;  %v665_v2 = vunpack.c.h.bf16 %v663_v42  ;;  %v671_v6 = vld [vmem:[#allocation5 + $0x10] sm:$0xff]  }
  0x35   :  { %716 = vmatprep.subr.bf16.mxu0 %v889_v1  ;;  %vm1056_vm11 = vmor %vm76_vm7, %vm96_vm8  ;;  %vm92_vm7 = vcmp.eq.s32.totalorder %v52_v39, %v948_v11  ;;  %v672_v7 = vunpack.c.l.bf16 %v671_v6  ;;  %v895_v11 = vmov 3   ;;  %v673_v31 = vunpack.c.h.bf16 %v671_v6 }
  0x36   :  { %vm639_vm1 = vmpackc.low %vm1056_vm11, %vm1051_vm10  ;;  %794 = vset.pattern.permute.xlu1 %v895_v11 }
  0x37   :  { %vm109_vm2 = vmor %vm73_vm12, %vm93_vm13  ;;  %vm305_vm12 = vcmask 261120   ;;  %805 = vset.pattern.permute.xlu0 %v896_v12  ;;  %796 = vperm.xlu1 %794, %v783_v8   ;;  %vm591_vm13 = vcmask 57344  }
  0x38   :  { %717 = vmatpush3.bf16.msk.msra.mxu0 %vm637_vm9, %v892_v18  ;;  %vm110_vm3 = vmor %vm74_vm14, %vm94_vm15  ;;  %744 = vmatprep.mubr.msk.f32.mxu1 %vm305_vm12, %v664_v43 }
  0x39   :  { %718 = vmatprep.subr.bf16.mxu0 %v889_v1  ;;  %vm641_vm8 = vmpackc.low %vm110_vm3, %vm109_vm2  ;;  %568 = vperm.xlu0 %805, %v986_v24  }
  0x3a   :  { %vm107_vm9 = vmor %vm71_vm4, %vm91_vm5 }
  0x3b   :  { %vm108_vm10 = vmor %vm72_vm6, %vm92_vm7  ;;  %801 = vperm.xlu1 %794, %v789_v9  }
  0x3c   :  { %719 = vmatpush3.bf16.msk.msra.mxu0 %vm639_vm1, %v892_v18  ;;  %vm643_vm11 = vmpackc.low %vm108_vm10, %vm107_vm9 }
  0x3d   :  { %720 = vmatprep.subr.bf16.mxu0 %v889_v1  ;;  %807 = vset.pattern.permute.xlu0 %v897_v13 }
  0x3f   :  { %806 = vset.pattern.permute.xlu1 %v897_v13 }
  0x40   :  { %721 = vmatpush3.bf16.msk.msra.mxu0 %vm641_vm8, %v892_v18  ;;  %581 = vperm.xlu1 %806, %v986_v24  }
  0x41   :  { %722 = vmatprep.subr.bf16.mxu0 %v889_v1 }
  0x44   :  { %723 = vmatpush3.bf16.msk.msra.mxu0 %vm643_vm11, %v892_v18 }
  0x47   :  { %725 = vmatmul.mubr.bf16.vlgmr.msra.gmra.mxu0 %v808_v40 }
  0x48   :  { %728 = vmatprep.mubr.msk.bf16.mxu0 %vm890_vm0, %v889_v1 }
  0x4f   :  { %729 = vmatmul.mubr.bf16.gmra.mxu0 %v809_v41 }
  0x50   :  { %732 = vmatprep.mubr.msk.bf16.mxu0 %vm890_vm0, %v889_v1  ;;  %vm553_vm0 = vcmask 64512  }
  0x57   :  { %733 = vmatmul.mubr.bf16.gmra.mxu0 %v810_v5 }
  0x9a   :  { %v261_v50 = vpop.permute.xlu1 %260 }
  0x9b   :  { %v271_v47 = vpop.permute.xlu0 %270 }
  0x9e   :  { %v256_v57 = vpop.permute.xlu1 %255 }
  0x9f   :  { %v266_v52 = vpop.permute.xlu0 %265 }
  0xa4   :  { %v299_v14 = vpop.permute.xlu1 %298 }
  0xa5   :  { %v303_v15 = vpop.permute.xlu0 %302 }
  0xa8   :  { %v295_v18 = vpop.permute.xlu1 %294 }
  0xa9   :  { %v291_v21 = vpop.permute.xlu0 %290 }
  0xad   :  { %v785_v40 = vpop.permute.xlu1 %784 }
  0xae   :  { %v791_v39 = vpop.permute.xlu0 %790 }
  0xb2   :  { %v797_v43 = vpop.permute.xlu1 %796 }
  0xb4   :  { %v569_v41 = vpop.permute.xlu0 %568 }
 0x107   :  { %v221_v45 = vpop.f32.mrf.mxu0 }
 0x108   :  { %v273_v61 = vadd.f32 %v256_v57, %v221_v45 }
 0x109   :  { %v726_v46 = vpop.f32.mrf.mxu0 }
 0x10a   :  { %v277_v1 = vmax.f32 %v273_v61, 0.0 }
 0x10b   :  { %v224_v48 = vpop.f32.mrf.mxu0 }
 0x10c   :  { %v274_v59 = vadd.f32 %v261_v50, %v224_v48  ;;  %v799_v48 = vunpack.i.h.bf16 %v797_v43 }
 0x10d   :  { %v727_v49 = vpop.f32.mrf.mxu0 }
 0x10e   :  { %v278_v63 = vmax.f32 %v274_v59, 0.0  ;;  %v798_v49 = vunpack.i.l.bf16 %v797_v43 }
 0x10f   :  { %v229_v51 = vpop.f32.mrf.mxu0 }
 0x110   :  { %v275_v55 = vadd.f32 %v266_v52, %v229_v51 }
 0x111   :  { %v730_v53 = vpop.f32.mrf.mxu0 }
 0x112   :  { %v279_v62 = vmax.f32 %v275_v55, 0.0  ;;  %v802_v55 = vpop.permute.xlu1 %801 }
 0x113   :  { %v232_v54 = vpop.f32.mrf.mxu0  ;;  %v803_v0 = vunpack.i.l.bf16 %v802_v55 }
 0x114   :  { %v276_v56 = vadd.f32 %v271_v47, %v232_v54 }
 0x115   :  { %v731_v58 = vpop.f32.mrf.mxu0 }
 0x116   :  { %v280_v60 = vmax.f32 %v276_v56, 0.0 }
 0x117   :  { %v237_v34 = vpop.f32.mrf.mxu0 }
 0x118   :  { %736 = vmatprep.subr.mxu1 %v280_v60 }
 0x119   :  { %737 = vmatpush3.msra.mxu1 %v280_v60  ;;  %v734_v35 = vpop.f32.mrf.mxu0 }
 0x11a   :  { %738 = vmatprep.subr.mxu1 %v279_v62 }
 0x11b   :  { %739 = vmatpush3.msra.mxu1 %v279_v62  ;;  %v240_v36 = vpop.f32.mrf.mxu0 }
 0x11c   :  { %740 = vmatprep.subr.mxu1 %v278_v63  ;;  %v244_v37 = vmul.f32 %v240_v36, %v237_v34 }
 0x11d   :  { %741 = vmatpush3.msra.mxu1 %v278_v63  ;;  %v735_v38 = vpop.f32.mrf.mxu0  ;;  %v804_v63 = vunpack.i.h.bf16 %v802_v55 }
 0x11e   :  { %742 = vmatprep.subr.mxu1 %v277_v1  ;;  %v571_v45 = vmul.f32 %v569_v41, %v244_v37 }
 0x11f   :  { %743 = vmatpush3.msra.mxu1 %v277_v1 }
 0x120   :  { %745 = vmatmul.mubr.msk.f32.vlgmr.msra.gmra.mxu1 %vm305_vm12, %v665_v2  ;;  %v572_v54 = vsel %vm553_vm0, %v571_v45, 0.0 }
 0x121   :  { %747 = vmatprep.mubr.msk.f32.mxu1 %vm305_vm12, %v668_v3  ;;  %v573_v61 = vrot.slane %v572_v54, 4 }
 0x123   :  { %v574_v6 = vadd.f32 %v573_v61, %v572_v54 }
 0x124   :  { %748 = vmatmul.mubr.msk.f32.gmra.mxu1 %vm305_vm12, %v669_v4 }
 0x125   :  { %758 = vmatprep.mubr.msk.f32.mxu1 %vm305_vm12, %v672_v7  ;;  %v575_v10 = vrot.slane %v574_v6, 2 }
 0x127   :  { %v576_v13 = vadd.f32 %v575_v10, %v574_v6 }
 0x1e0   :  { %v746_v16 = vpop.f32.mrf.mxu1 }
 0x1e1   :  { %v390_v23 = vadd.f32 %v746_v16, %v295_v18 }
 0x1e2   :  { %v384_v17 = vpop.f32.mrf.mxu1 }
 0x1e3   :  { %v385_v27 = vadd.f32 %v384_v17, %v291_v21  ;;  %v404_v29 = vmax.f32 %v390_v23, 0.0  ;;  %v577_v17 = vrot.slane %v576_v13, 1  ;;  %v582_v21 = vpop.permute.xlu1 %581 }
 0x1e4   :  { %v749_v19 = vpop.f32.mrf.mxu1 }
 0x1e5   :  { %v400_v20 = vadd.f32 %v749_v19, %v303_v15  ;;  %v403_v24 = vmax.f32 %v385_v27, 0.0 }
 0x1e6   :  { %v394_v22 = vpop.f32.mrf.mxu1 }
 0x1e7   :  { %v406_v25 = vmax.f32 %v400_v20, 0.0  ;;  %v395_v26 = vadd.f32 %v394_v22, %v299_v14  ;;  %v578_v20 = vadd.f32 %v577_v17, %v576_v13 }
 0x1e9   :  { %v405_v28 = vmax.f32 %v395_v26, 0.0  ;;  %750 = vmatprep.subr.mxu1 %v406_v25 }
 0x1ea   :  { %751 = vmatpush3.msra.mxu1 %v406_v25 }
 0x1eb   :  { %752 = vmatprep.subr.mxu1 %v405_v28 }
 0x1ec   :  { %753 = vmatpush3.msra.mxu1 %v405_v28 }
 0x1ed   :  { %754 = vmatprep.subr.mxu1 %v404_v29 }
 0x1ee   :  { %755 = vmatpush3.msra.mxu1 %v404_v29 }
 0x1ef   :  { %756 = vmatprep.subr.mxu1 %v403_v24 }
 0x1f0   :  { %757 = vmatpush3.msra.mxu1 %v403_v24 }
 0x1f1   :  { %759 = vmatmul.mubr.msk.f32.vlgmr.msra.gmra.mxu1 %vm305_vm12, %v673_v31 }
 0x1f2   :  { %761 = vmatprep.mubr.msk.f32.mxu1 %vm305_vm12, %v676_v32 }
 0x1f5   :  { %762 = vmatmul.mubr.msk.f32.gmra.mxu1 %vm305_vm12, %v677_v33 }
 0x2b1   :  { %v760_v42 = vpop.f32.mrf.mxu1 }
 0x2b2   :  { %v815_v44 = vadd.high.f32.bf16 %v760_v42, %v785_v40 }
 0x2b3   :  { %v510_v46 = vpop.f32.mrf.mxu1 }
 0x2b4   :  { %v530_v47 = vmax.f32 %v815_v44, 0.0  ;;  %v816_v50 = vadd.low.f32.bf16 %v510_v46, %v785_v40 }
 0x2b5   :  { %v763_v51 = vpop.f32.mrf.mxu1 }
 0x2b6   :  { %v529_v52 = vmax.f32 %v816_v50, 0.0  ;;  %v817_v53 = vadd.high.f32.bf16 %v763_v51, %v791_v39  ;;  %v550_v57 = vmul.f32 %v799_v48, %v530_v47 }
 0x2b7   :  { %v520_v56 = vpop.f32.mrf.mxu1 }
 0x2b8   :  { %v549_v58 = vmul.f32 %v798_v49, %v529_v52  ;;  %v532_v59 = vmax.f32 %v817_v53, 0.0  ;;  %v818_v60 = vadd.low.f32.bf16 %v520_v56, %v791_v39  ;;  %v555_v2 = vsel %vm553_vm0, %v550_v57, 0.0 }
 0x2ba   :  { %v554_v62 = vsel %vm553_vm0, %v549_v58, 0.0  ;;  %v531_v1 = vmax.f32 %v818_v60, 0.0  ;;  %v552_v3 = vmul.f32 %v804_v63, %v532_v59 }
 0x2bb   :  { %v556_v5 = vadd.f32 %v555_v2, %v554_v62 }
 0x2bc   :  { %v551_v4 = vmul.f32 %v803_v0, %v531_v1  ;;  %v559_v9 = vsel %vm553_vm0, %v552_v3, 0.0 }
 0x2be   :  { %v557_v7 = vsel %vm553_vm0, %v551_v4, 0.0 }
 0x2bf   :  { %v558_v8 = vadd.f32 %v557_v7, %v556_v5 }
 0x2c1   :  { %v560_v11 = vadd.f32 %v559_v9, %v558_v8 }
 0x2c3   :  { %v561_v12 = vrot.slane %v560_v11, 4 }
 0x2c5   :  { %v562_v14 = vadd.f32 %v561_v12, %v560_v11 }
 0x2c7   :  { %v563_v15 = vrot.slane %v562_v14, 2 }
 0x2c9   :  { %v564_v16 = vadd.f32 %v563_v15, %v562_v14 }
 0x2cb   :  { %v565_v18 = vrot.slane %v564_v16, 1 }
 0x2cd   :  { %v566_v19 = vadd.f32 %v565_v18, %v564_v16 }
 0x2cf   :  { %v579_v22 = vadd.f32 %v578_v20, %v566_v19 }
 0x2d1   :  { %v584_v23 = vadd.f32 %v582_v21, %v579_v22 }
 0x2d3   :  { %v653_v25 = vmul.f32 -1.442695, %v584_v23 }
 0x2d5   :  { %811 = vpow2.f32 %v653_v25 }
 0x2e2   :  { %v812_v26 = vpop.eup %811 }
 0x2e3   :  { %v588_v27 = vadd.f32 1.0, %v812_v26 }
 0x2e5   :  { %813 = vrcp.f32 %v588_v27 }
 0x2f2   :  { %v814_v28 = vpop.eup %813 }
 0x2f3   :  { %592 = vst.msk [vmem:[#allocation7] sm:$0x1] %vm591_vm13, %v814_v28 }
 0x2f4   :  { %870 = shalt.err (!%p867_p0)
}
 0x2f5   :  { %602 = dma.vmem_to_hbm [thread:$0]  %s600_s6, 16, %s1116_s4, [#allocation4]  }
 0x2f6   :  { %883 = dma.done.wait [#allocation4], 16  }
 0x2f7   :  { %884 = vsyncadd [#allocation4], 4294967280 }
 0x2f8   :  { %606 = vsyncpa [#allocation3], 1 }
 0x2f9   :  { %607 = vsyncpa [#allocation6], 1 }
 0x2fa   :  { %608 = vsyncpa [#allocation4], 1 }

</bundles_post_ra>
